<compile_context>
chip_gen: v7x
topology: tpu7x:2x2x1
jax: 0.10.0
libtpu: 0.0.40
codegen_flags: <defaults>
</compile_context>

<pallas_src>
import jax
import jax.numpy as jnp
from jax.experimental import pallas as pl
from jax.experimental.pallas import tpu as pltpu


def make_classifier_kernel(mxu_dtype):
    """Kernel factory; mxu_dtype controls the dtype of MXU matmul operands."""
    f32 = jnp.float32

    def kernel(a_ref, deg_ref, gcn_ref, fc_ref, pool_ref, out_ref):
        a = a_ref[0]                       # (N, N)   f32 normalized adjacency
        deg_row = deg_ref[0]               # (1, N)   f32 in-degree feature (lane-dense)
        gcn = gcn_ref[...]                 # (H+3, H) packed [W2; w1; b1; b2]
        fc = fc_ref[...]                   # (H+1, Cpad) packed [Wfc; bfc], zero-padded
        pool = pool_ref[0]                 # (G, N)   mean-pooling matrix

        h = gcn.shape[1]
        w2 = gcn[0:h]                      # (H, H)
        w1 = gcn[h:h + 1]                  # (1, H)
        b1 = gcn[h + 1:h + 2]              # (1, H)
        b2 = gcn[h + 2:h + 3]              # (1, H)
        wfc = fc[0:h]                      # (H, Cpad)
        bfc = fc[h:h + 1]                  # (1, Cpad)

        am = a.astype(mxu_dtype)

        # GraphConv1 (in_dim == 1):  A @ (deg @ w1) == (A @ deg) * w1.
        # A @ deg as a VPU multiply + lane reduce — no (N,N)x(N,H) MXU pass.
        agg = jnp.sum(a * deg_row, axis=1, keepdims=True)          # (N, 1) f32
        h1 = jnp.maximum(agg * w1 + b1, 0.0)                        # (N, H) f32, VPU

        # GraphConv2: relu(A @ (h1 @ W2) + b2); MXU operands in mxu_dtype, f32 accum.
        x2 = jnp.dot(h1.astype(mxu_dtype), w2.astype(mxu_dtype),
                     preferred_element_type=f32)                    # (N, H)
        h2 = jnp.maximum(jnp.dot(am, x2.astype(mxu_dtype),
                                 preferred_element_type=f32) + b2, 0.0)

        # Tail reorder (associativity): node-level logits first, then mean-pool.
        node_logits = jnp.dot(h2.astype(mxu_dtype), wfc.astype(mxu_dtype),
                              preferred_element_type=f32)           # (N, Cpad)
        out_ref[0] = (jnp.dot(pool.astype(mxu_dtype), node_logits.astype(mxu_dtype),
                              preferred_element_type=f32) + bfc)    # (G, Cpad)

    return kernel


def classifier_forward(a_hat, deg, w1, b1, w2, b2, wfc, bfc, pool,
                       *, mxu_dtype=jnp.float32):
    """Batched Classifier forward. a_hat:(B,N,N) deg:(B,N,1) pool:(B,G,N) -> (B,G,C)."""
    B, N, _ = a_hat.shape
    G = pool.shape[1]
    H = w2.shape[0]
    C = wfc.shape[1]
    c_pad = ((C + 127) // 128) * 128            # lane-dense output slab

    deg_row = jnp.swapaxes(deg, 1, 2)                               # (B, 1, N)
    gcn_params = jnp.concatenate([w2, w1, b1, b2], axis=0)          # (H+3, H)
    fc_params = jnp.pad(jnp.concatenate([wfc, bfc], axis=0),
                        ((0, 0), (0, c_pad - C)))                   # (H+1, c_pad)

    out = pl.pallas_call(
        make_classifier_kernel(mxu_dtype),
        out_shape=jax.ShapeDtypeStruct((B, G, c_pad), jnp.float32),
        grid=(B,),
        in_specs=[
            pl.BlockSpec((1, N, N), lambda b: (b, 0, 0)),       # A_hat      (per batch)
            pl.BlockSpec((1, 1, N), lambda b: (b, 0, 0)),       # deg row    (per batch)
            pl.BlockSpec((H + 3, H), lambda b: (0, 0)),         # GCN params (shared)
            pl.BlockSpec((H + 1, c_pad), lambda b: (0, 0)),     # FC params  (shared)
            pl.BlockSpec((1, G, N), lambda b: (b, 0, 0)),       # pool       (per batch)
        ],
        out_specs=pl.BlockSpec((1, G, c_pad), lambda b: (b, 0, 0)),
        compiler_params=pltpu.CompilerParams(
            dimension_semantics=("parallel",)),
    )(a_hat, deg_row, gcn_params, fc_params, pool)

    return out[:, :, :C]


def reference_forward(a_hat, deg, w1, b1, w2, b2, wfc, bfc, pool):
    """Pure-JAX reference with the original (uncollapsed) op order."""
    h1 = jnp.maximum(a_hat @ (deg @ w1) + b1, 0.0)
    h2 = jnp.maximum(a_hat @ (h1 @ w2) + b2, 0.0)
    hg = pool @ h2
    return hg @ wfc + bfc


if __name__ == "__main__":
    # Sizes: 2 mini-batches (grid axis), each with 8 graphs x 16 nodes => N=128
    # nodes per program (fills an MXU tile); in_dim=1, hidden_dim=32, n_classes=4.
    n_per_graph = 16
    graphs_per_batch = 8
    n_batches = 2
    N = n_per_graph * graphs_per_batch            # 128
    in_dim, hidden_dim, n_classes = 1, 32, 4

    key = jax.random.PRNGKey(0)
    k_adj, k_w1, k_b1, k_w2, k_b2, k_wfc, k_bfc = jax.random.split(key, 7)

    # --- synthetic batched graphs: block-diagonal random adjacency + self loops ------
    adj = (jax.random.uniform(k_adj, (n_batches, N, N)) < 0.2).astype(jnp.float32)
    graph_id = jnp.repeat(jnp.arange(graphs_per_batch), n_per_graph)         # (N,)
    same_graph = (graph_id[:, None] == graph_id[None, :]).astype(jnp.float32)
    adj = adj * same_graph[None]                                             # block diag
    adj = jnp.maximum(adj, jnp.eye(N, dtype=jnp.float32)[None])              # self loops
    # adj[b, i, j] = 1 iff edge j -> i (rows = dst, cols = src)

    in_deg = adj.sum(axis=2)                                                 # (B, N)
    out_deg = adj.sum(axis=1)                                                # (B, N)
    # DGL GraphConv norm='both': D_in^{-1/2} A D_out^{-1/2}
    a_hat = ((in_deg[:, :, None] ** -0.5) * adj
             * (out_deg[:, None, :] ** -0.5)).astype(jnp.float32)
    deg_feat = in_deg[:, :, None].astype(jnp.float32)                        # (B, N, 1)

    # per-graph mean-pooling matrix (G, N), same structure every mini-batch here
    pool_one = (same_graph[::n_per_graph, :] / float(n_per_graph)).astype(jnp.float32)
    pool = jnp.tile(pool_one[None], (n_batches, 1, 1))                       # (B, G, N)

    # --- deterministic parameter init -------------------------------------------------
    scale1 = 1.0 / jnp.sqrt(float(in_dim))
    scale2 = 1.0 / jnp.sqrt(float(hidden_dim))
    w1 = jax.random.uniform(k_w1, (in_dim, hidden_dim), minval=-scale1, maxval=scale1)
    b1 = jax.random.uniform(k_b1, (1, hidden_dim), minval=-scale1, maxval=scale1)
    w2 = jax.random.uniform(k_w2, (hidden_dim, hidden_dim), minval=-scale2, maxval=scale2)
    b2 = jax.random.uniform(k_b2, (1, hidden_dim), minval=-scale2, maxval=scale2)
    wfc = jax.random.uniform(k_wfc, (hidden_dim, n_classes), minval=-scale2, maxval=scale2)
    bfc = jax.random.uniform(k_bfc, (1, n_classes), minval=-scale2, maxval=scale2)
    w1, b1, w2, b2, wfc, bfc = (x.astype(jnp.float32) for x in (w1, b1, w2, b2, wfc, bfc))

    ref = reference_forward(a_hat, deg_feat, w1, b1, w2, b2, wfc, bfc, pool)

    # --- f32 MXU path (default) -------------------------------------------------------
    out = classifier_forward(a_hat, deg_feat, w1, b1, w2, b2, wfc, bfc, pool)
    out = jax.block_until_ready(out)
    assert out.shape == (n_batches, graphs_per_batch, n_classes)
    # tolerance allows for the algebraic reorder (GraphConv1 collapse / pooled tail)
    # interacting with the TPU's default matmul precision
    assert jnp.allclose(out, ref, atol=2e-2, rtol=2e-2), (out, ref)

    # --- bf16-MXU-operand path (v6e/v7x-oriented; elementwise stays f32) ---------------
    out_bf16 = classifier_forward(a_hat, deg_feat, w1, b1, w2, b2, wfc, bfc, pool,
                                  mxu_dtype=jnp.bfloat16)
    out_bf16 = jax.block_until_ready(out_bf16)
    assert jnp.allclose(out_bf16, ref, atol=1e-1, rtol=1e-1), (out_bf16, ref)

    print("KERNEL_OK")
</pallas_src>

<mosaic_0001>
module attributes {stable_mosaic.version = 11 : i64} {
  func.func @kernel(%arg0: i32, %arg1: memref<1x128x128xf32, #tpu.memory_space<vmem>>, %arg2: memref<1x1x128xf32, #tpu.memory_space<vmem>>, %arg3: memref<35x32xf32, #tpu.memory_space<vmem>>, %arg4: memref<33x128xf32, #tpu.memory_space<vmem>>, %arg5: memref<1x8x128xf32, #tpu.memory_space<vmem>>, %arg6: memref<1x8x128xf32, #tpu.memory_space<vmem>>) attributes {dimension_semantics = [#tpu.dimension_semantics<parallel>], iteration_bounds = array<i64: 2>, scalar_prefetch = 0 : i64, scratch_operands = 0 : i64, tpu.core_type = #tpu.core_type<tc>, window_params = [{transform_indices = @transform_0, window_bounds = array<i64: 1, 128, 128>}, {transform_indices = @transform_1, window_bounds = array<i64: 1, 1, 128>}, {pipeline_mode = #tpu.pipeline_mode<synchronous>, transform_indices = @transform_2, window_bounds = array<i64: 35, 32>}, {pipeline_mode = #tpu.pipeline_mode<synchronous>, transform_indices = @transform_3, window_bounds = array<i64: 33, 128>}, {transform_indices = @transform_4, window_bounds = array<i64: 1, 8, 128>}, {transform_indices = @transform_5, window_bounds = array<i64: 1, 8, 128>}]} {
    %c0 = arith.constant 0 : index
    %c0_0 = arith.constant 0 : index
    %c0_1 = arith.constant 0 : index
    %0 = vector.load %arg1[%c0, %c0_0, %c0_1] : memref<1x128x128xf32, #tpu.memory_space<vmem>>, vector<1x128x128xf32>
    %1 = vector.shape_cast %0 : vector<1x128x128xf32> to vector<128x128xf32>
    %c0_2 = arith.constant 0 : index
    %c0_3 = arith.constant 0 : index
    %c0_4 = arith.constant 0 : index
    %2 = vector.load %arg2[%c0_2, %c0_3, %c0_4] : memref<1x1x128xf32, #tpu.memory_space<vmem>>, vector<1x1x128xf32>
    %3 = vector.shape_cast %2 : vector<1x1x128xf32> to vector<1x128xf32>
    %c0_5 = arith.constant 0 : index
    %c0_6 = arith.constant 0 : index
    %4 = vector.load %arg3[%c0_5, %c0_6] : memref<35x32xf32, #tpu.memory_space<vmem>>, vector<35x32xf32>
    %c0_7 = arith.constant 0 : index
    %c0_8 = arith.constant 0 : index
    %5 = vector.load %arg4[%c0_7, %c0_8] : memref<33x128xf32, #tpu.memory_space<vmem>>, vector<33x128xf32>
    %c0_9 = arith.constant 0 : index
    %c0_10 = arith.constant 0 : index
    %c0_11 = arith.constant 0 : index
    %6 = vector.load %arg5[%c0_9, %c0_10, %c0_11] : memref<1x8x128xf32, #tpu.memory_space<vmem>>, vector<1x8x128xf32>
    %7 = vector.shape_cast %6 : vector<1x8x128xf32> to vector<8x128xf32>
    %8 = vector.extract_strided_slice %4 {offsets = [0, 0], sizes = [32, 32], strides = [1, 1]} : vector<35x32xf32> to vector<32x32xf32>
    %9 = vector.extract_strided_slice %4 {offsets = [32, 0], sizes = [1, 32], strides = [1, 1]} : vector<35x32xf32> to vector<1x32xf32>
    %10 = vector.extract_strided_slice %4 {offsets = [33, 0], sizes = [1, 32], strides = [1, 1]} : vector<35x32xf32> to vector<1x32xf32>
    %11 = vector.extract_strided_slice %4 {offsets = [34, 0], sizes = [1, 32], strides = [1, 1]} : vector<35x32xf32> to vector<1x32xf32>
    %12 = vector.extract_strided_slice %5 {offsets = [0, 0], sizes = [32, 128], strides = [1, 1]} : vector<33x128xf32> to vector<32x128xf32>
    %13 = vector.extract_strided_slice %5 {offsets = [32, 0], sizes = [1, 128], strides = [1, 1]} : vector<33x128xf32> to vector<1x128xf32>
    %14 = vector.broadcast %3 : vector<1x128xf32> to vector<128x128xf32>
    %15 = arith.mulf %1, %14 : vector<128x128xf32>
    %cst = arith.constant dense<0.000000e+00> : vector<128xf32>
    %16 = vector.multi_reduction <add>, %15, %cst [1] : vector<128x128xf32> to vector<128xf32>
    %17 = vector.shape_cast %16 : vector<128xf32> to vector<128x1xf32>
    %18 = vector.broadcast %17 : vector<128x1xf32> to vector<128x32xf32>
    %19 = vector.broadcast %9 : vector<1x32xf32> to vector<128x32xf32>
    %20 = arith.mulf %18, %19 : vector<128x32xf32>
    %21 = vector.broadcast %10 : vector<1x32xf32> to vector<128x32xf32>
    %22 = arith.addf %20, %21 : vector<128x32xf32>
    %cst_12 = arith.constant 0.000000e+00 : f32
    %23 = vector.broadcast %cst_12 : f32 to vector<128x32xf32>
    %24 = arith.maximumf %22, %23 : vector<128x32xf32>
    %cst_13 = arith.constant dense<0.000000e+00> : vector<128x32xf32>
    %25 = tpu.matmul %24, %8, %cst_13 {dimension_numbers = #tpu.dot_dimension_numbers<[1], [0], [0], [1], [0, 0, 1, 1], [], []>} : vector<128x32xf32>, vector<32x32xf32>, vector<128x32xf32> -> vector<128x32xf32>
    %cst_14 = arith.constant dense<0.000000e+00> : vector<128x32xf32>
    %26 = tpu.matmul %1, %25, %cst_14 {dimension_numbers = #tpu.dot_dimension_numbers<[1], [0], [0], [1], [0, 0, 1, 1], [], []>} : vector<128x128xf32>, vector<128x32xf32>, vector<128x32xf32> -> vector<128x32xf32>
    %27 = vector.broadcast %11 : vector<1x32xf32> to vector<128x32xf32>
    %28 = arith.addf %26, %27 : vector<128x32xf32>
    %cst_15 = arith.constant 0.000000e+00 : f32
    %29 = vector.broadcast %cst_15 : f32 to vector<128x32xf32>
    %30 = arith.maximumf %28, %29 : vector<128x32xf32>
    %cst_16 = arith.constant dense<0.000000e+00> : vector<128x128xf32>
    %31 = tpu.matmul %30, %12, %cst_16 {dimension_numbers = #tpu.dot_dimension_numbers<[1], [0], [0], [1], [0, 0, 1, 1], [], []>} : vector<128x32xf32>, vector<32x128xf32>, vector<128x128xf32> -> vector<128x128xf32>
    %cst_17 = arith.constant dense<0.000000e+00> : vector<8x128xf32>
    %32 = tpu.matmul %7, %31, %cst_17 {dimension_numbers = #tpu.dot_dimension_numbers<[1], [0], [0], [1], [0, 0, 1, 1], [], []>} : vector<8x128xf32>, vector<128x128xf32>, vector<8x128xf32> -> vector<8x128xf32>
    %33 = vector.broadcast %13 : vector<1x128xf32> to vector<8x128xf32>
    %34 = arith.addf %32, %33 : vector<8x128xf32>
    %c0_18 = arith.constant 0 : index
    %c0_19 = arith.constant 0 : index
    %c0_20 = arith.constant 0 : index
    %35 = vector.load %arg6[%c0_18, %c0_19, %c0_20] : memref<1x8x128xf32, #tpu.memory_space<vmem>>, vector<1x8x128xf32>
    %36 = vector.shape_cast %35 : vector<1x8x128xf32> to vector<8x128xf32>
    %37 = vector.shape_cast %34 : vector<8x128xf32> to vector<1x8x128xf32>
    tpu.vector_store %arg6[%c0_18, %c0_19, %c0_20], %37 {strides = array<i32>} : memref<1x8x128xf32, #tpu.memory_space<vmem>>, vector<1x8x128xf32>,
    return
  }
  func.func @transform_0(%arg0: i32) -> (i32, i32, i32) {
    %c0_i32 = arith.constant 0 : i32
    %c0_i32_0 = arith.constant 0 : i32
    %c0_i32_1 = arith.constant 0 : i32
    return %arg0, %c0_i32, %c0_i32_0 : i32, i32, i32
  }
  func.func @transform_1(%arg0: i32) -> (i32, i32, i32) {
    %c0_i32 = arith.constant 0 : i32
    %c0_i32_0 = arith.constant 0 : i32
    %c0_i32_1 = arith.constant 0 : i32
    return %arg0, %c0_i32, %c0_i32_0 : i32, i32, i32
  }
  func.func @transform_2(%arg0: i32) -> (i32, i32) {
    %c0_i32 = arith.constant 0 : i32
    %c0_i32_0 = arith.constant 0 : i32
    %c0_i32_1 = arith.constant 0 : i32
    return %c0_i32, %c0_i32_0 : i32, i32
  }
  func.func @transform_3(%arg0: i32) -> (i32, i32) {
    %c0_i32 = arith.constant 0 : i32
    %c0_i32_0 = arith.constant 0 : i32
    %c0_i32_1 = arith.constant 0 : i32
    return %c0_i32, %c0_i32_0 : i32, i32
  }
  func.func @transform_4(%arg0: i32) -> (i32, i32, i32) {
    %c0_i32 = arith.constant 0 : i32
    %c0_i32_0 = arith.constant 0 : i32
    %c0_i32_1 = arith.constant 0 : i32
    return %arg0, %c0_i32, %c0_i32_0 : i32, i32, i32
  }
  func.func @transform_5(%arg0: i32) -> (i32, i32, i32) {
    %c0_i32 = arith.constant 0 : i32
    %c0_i32_0 = arith.constant 0 : i32
    %c0_i32_1 = arith.constant 0 : i32
    return %arg0, %c0_i32, %c0_i32_0 : i32, i32, i32
  }
}

</mosaic_0001>

<bundles_post_ra>
// kernel: tpu_custom_call.1
= control target key start
LH: loop header
LB: loop body
LE: loop exit
PB: predicated region body
PF: predicated region fallthrough
CT: control target
= control target key end

     0   :  { %10 = vsyncpa [#allocation3], 0  ;;  %s2054_s0 = inlined_call_operand.hbm [shape: f32[2,128,128], index: 0, kind: input, shape index: {}]   ;;  %s2055_s1 = inlined_call_operand.vmem [shape: f32[2,1,128], index: 1, kind: input, shape index: {}]   ;;  %s2056_s2 = inlined_call_operand.vmem [shape: f32[35,32], index: 2, kind: input, shape index: {}]   ;;  %s2057_s3 = inlined_call_operand.vmem [shape: f32[33,128], index: 3, kind: input, shape index: {}]   ;;  %s2058_s4 = inlined_call_operand.vmem [shape: f32[2,8,128], index: 4, kind: input, shape index: {}]   ;;  %s2059_s5 = inlined_call_operand.hbm [shape: f32[2,8,128], index: 5, kind: output, shape index: {}]  }
   0x1   :  { %12 = vsyncpa [#allocation3 + $0x1], 0 }
   0x2   :  { %13 = vsyncpa [#allocation4], 0 }
   0x3   :  { %15 = vsyncpa [#allocation4 + $0x1], 0  ;;  %s1695_s18 = smov 0   ;;  %s1697_s19 = smov 0  }
   0x4   :  { %s1699_s20 = smov 0   ;;  %s1701_s21 = smov 0  }
   0x5 LB: > { %s1716_s22 = sadd.s32 4294967295, %s1656_s21   ;;  %s1144_s23 = sadd.s32 4294967294, %s1656_s21   ;;  %s1656_s21 = sphi %s1701_s21, %s2072_s21   ;;  %s1652_s20 = sphi %s1699_s20, %s2071_s20   ;;  %s1648_s19 = sphi %s1697_s19, %s2070_s19   ;;  %s1644_s18 = sphi %s1695_s18, %s2069_s18  }
   0x6   : > { %s1720_s24 = sadd.s32 1, %s1656_s21   ;;  %s28_s25 = sadd.s32 1, %s1652_s20 }
   0x7   : > { %s25_s26 = ssub.s32 %s1656_s21, %s1720_s24  ;;  %p35_p0 = scmp.ne.s32.totalorder %s1652_s20, %s1648_s19 }
   0x8   : > { %p26_p1 = scmp.eq.s32.totalorder %s25_s26, 0  ;;  %p36_p2 = scmp.eq.s32.totalorder %s1656_s21, 0 }
   0x9   : > { %p41_p3 = scmp.ne.s32.totalorder %s1648_s19, %s1644_s18  ;;  %p42_p4 = scmp.eq.s32.totalorder %s1716_s22, 0 }
   0xa   : > { %s1732_s27 = scalar_select %p26_p1, %s1652_s20, %s28_s25  }
   0xb   : > { %p1734_p5 = por %p36_p2, %p35_p0  ;;  %p1738_p6 = por %p42_p4, %p41_p3 }
   0xc   : > { %p159_p7 = scmp.eq.s32.totalorder %s1716_s22, 1  ;;  %p165_p8 = scmp.eq.s32.totalorder %s1144_s23, 1 }
   0xd   : > { %p1521_p10 = scmp.lt.s32.totalorder %s1656_s21, 2  ;;  %s191_s7 = sand.u32 1, %s1652_s20  }
   0xe   : > { %p1745_p11 = por %p159_p7, %p35_p0  ;;  %p1749_p12 = por %p165_p8, %p41_p3 }
   0xf   : > { %s1192_s8 = sshll.u32 %s1656_s21, 11  ;;  %s1147_s9 = sshll.u32 %s191_s7, 7 }
  0x10   : > { %s2063_s30 = scalar_select %p1745_p11, 1, 0 }
  0x11   : > { %s2064_s6 = scalar_select %p1749_p12, 1, 0 }
  0x12   : > { %s1758_s12 = scalar_lea.hbm %s2054_s0, %s1192_s8  ;;  %s195_s13 = scalar_lea.vmem [#allocation2], %s1147_s9 }
  0x13   : > { %s202_s14 = sshll.u32 %s195_s13, 4  ;;  %p1762_p13 = pnand %p1521_p10, %p1734_p5  ;;  %s1766_s14 = int_to_ptr.vmem [resolvable:$true] %s202_s14 }
  0x14   : > { %s1768_s16 = scalar_lea.sflag [#allocation3], %s191_s7  ;;  %s1560_s17 = scalar_lea.hbm %s1758_s12, 2048 }
  0x15   : > { %p1561_p0 = scmp.ne.s32.totalorder %s1758_s12, %s1560_s17  ;;  %p1562_p1 = pneg %p1762_p13 }
  0x16   : > { %s1565_s26 = scalar_lea.hbm %s2054_s0, 4096  ;;  %p1566_p4 = scmp.lt.u32.totalorder %s1758_s12, %s2054_s0 }
  0x17   : > { %p1563_p2 = pnand %p1562_p1, %p1561_p0  ;;  %p1567_p5 = scmp.lt.u32.totalorder %s1565_s26, %s1560_s17 }
  0x18   : > { %p1569_p8 = scmp.lt.u32.totalorder %s1560_s17, %s1758_s12 }
  0x19   : > { %p1564_p3 = pneg %p1563_p2  ;;  %p1568_p7 = por %p1567_p5, %p1566_p4 }
  0x1b   : > { %p1570_p10 = por %p1569_p8, %p1568_p7 }
  0x1d   : > { %p1571_p9 = pnand %p1570_p10, %p1564_p3 }
  0x1f   : > { %1574 = shalt.err (!%p1571_p9)
}
  0x20   : > { %s1575_s7 = scalar_lea.vmem %s1766_s14, 2048  ;;  %s1658_s9 = smov [#allocation2]  }
  0x21   : > { %p1576_p0 = scmp.ne.s32.totalorder %s1766_s14, %s1575_s7  ;;  %s1580_s10 = sshll.u32 %s1658_s9, 4  ;;  %s1581_s10 = int_to_ptr.vmem [resolvable:$false] %s1580_s10 }
  0x22   : > { %s1582_s11 = scalar_lea.vmem %s1581_s10, 4096  ;;  %p1583_p11 = scmp.lt.s32.totalorder %s1766_s14, %s1581_s10 }
  0x23   : > { %p1578_p2 = pnand %p1576_p0, %p1562_p1  ;;  %p1584_p4 = scmp.lt.s32.totalorder %s1582_s11, %s1575_s7 }
  0x25   : > { %p1579_p12 = pneg %p1578_p2  ;;  %p1585_p5 = por %p1584_p4, %p1583_p11 }
  0x27   : > { %p1586_p7 = pnand %p1585_p5, %p1579_p12 }
  0x29   : > { %1589 = shalt.err (!%p1586_p7)
}
  0x2a   : > { %s1659_s13 = smov 128   ;;  %s1660_s17 = smov 8  }
  0x2b   : > { %1516 = dma.hbm_to_vmem [thread:$0]  (!%p1762_p13), %s1758_s12, 2048, %s1766_s14, %s1768_s16, %s1659_s13, %s1659_s13, %s1660_s17  }
  0x2c   : > { %p1150_p9 = scmp.ge.s32.totalorder %s1656_s21, 1  ;;  %p223_p1 = scmp.lt.s32.totalorder %s1656_s21, 3 }
  0x2e   : > { %p224_p3 = pnand %p1150_p9, %p223_p1 }
  0x2f   : > { %s1799_s23 = sand.u32 (!%p224_p3), 1, %s1648_s19  }
  0x30   : > { %227 = sbr.rel (%p224_p3) target bundleno = 1155 (0x483), region = 40  ;;  %s1151_s25 = sshll.u32 (!%p224_p3), %s1799_s23, 7 }
  0x31   : > { %s230_s26 = scalar_lea.sflag (!%p224_p3), [#allocation3], %s1799_s23  ;;  %s1803_s28 = scalar_lea.vmem (!%p224_p3), [#allocation2], %s1151_s25 }
  0x37   : > { %1635 = dma.done.wait (%p1738_p6), %s230_s26, 2048  }
  0x38   : > { %1637 = vsyncadd (%p1738_p6), %s230_s26, 4294965248  ;;  %p267_p11 = scmp.lt.s32.totalorder %s1716_s22, 1  ;;  %v274_v0 = vld [vmem:[%s1803_s28] sm:$0xff]  ;;  %v1819_v2 = vld [vmem:[%s1803_s28 + $0x10] sm:$0xff]  ;;  %v356_v39 = vlaneseq  ;;  %vm412_vm0 = vcmask 261120   ;;  %vm1662_vm1 = vmmov 0  }
  0x39   : > { %v1823_v5 = vld [vmem:[%s1803_s28 + $0x8] sm:$0xff]  ;;  %v1826_v6 = vld [vmem:[%s1803_s28 + $0x18] sm:$0xff]  ;;  %1346 = vmatprep.mubr.f32.mxu1 %v274_v0  ;;  %v1831_v9 = vld [vmem:[%s1803_s28 + $0x20] sm:$0xff]  ;;  %s1152_s25 = sshll.u32 %s1799_s23, 3  ;;  %s1040_s7 = scalar_lea.sflag [#allocation4], %s1799_s23 }
  0x3a   : > { %s1811_s12 = scalar_select %p267_p11, %s1716_s22, 1  ;;  %v1834_v10 = vld [vmem:[%s1803_s28 + $0x28] sm:$0xff]  ;;  %v1839_v13 = vld [vmem:[%s1803_s28 + $0x30] sm:$0xff]  ;;  %v1842_v14 = vld [vmem:[%s1803_s28 + $0x38] sm:$0xff]  ;;  %v1890_v40 = vshrl.u32 %v356_v39, 7 }
  0x3b   : > { %v1847_v17 = vld [vmem:[%s1803_s28 + $0x40] sm:$0xff]  ;;  %v1850_v18 = vld [vmem:[%s1803_s28 + $0x48] sm:$0xff]  ;;  %v1855_v21 = vld [vmem:[%s1803_s28 + $0x50] sm:$0xff]  ;;  %s266_s14 = scalar_lea.vmem [#allocation5], %s1152_s25  ;;  %p2066_p12 = scmp.ne.s32.totalorder %s2063_s30, 0 }
  0x3c   : > { %s269_s16 = scalar_lea.vmem %s2055_s1, %s1811_s12  ;;  %v1858_v22 = vld [vmem:[%s1803_s28 + $0x58] sm:$0xff]  ;;  %v291_v23 = vld [vmem:[%s2056_s2] sm:$0xff]  ;;  %v292_v24 = vld [vmem:[%s2056_s2 + $0x8] sm:$0xff]  ;;  %v358_v41 = vsub.s32 0, %v1890_v40  ;;  %v378_v43 = vsub.s32 1, %v1890_v40  ;;  %s1153_s10 = sshll.u32 %s1811_s12, 3 }
  0x3d   : > { %v1154_v1 = vld [vmem:[%s269_s16] ss:$0 sm:$0xff]  ;;  %v1437_v25 = vpack.c.bf16 %v292_v24, %v291_v23  ;;  %v1872_v29 = vld [vmem:[%s1803_s28 + $0x68] sm:$0xff]  ;;  %v293_v30 = vld [vmem:[%s2056_s2 + $0x10] sm:$0xff]  ;;  %s273_s17 = scalar_lea.vmem %s2058_s4, %s1153_s10  ;;  %s1189_s12 = sshll.u32 %s1716_s22, 7 }
  0x3e   : > { %v308_v3 = vmul.f32 %v1154_v1, %v274_v0  ;;  %v310_v4 = vmul.f32 %v1154_v1, %v1819_v2  ;;  %v309_v7 = vmul.f32 %v1154_v1, %v1823_v5  ;;  %v311_v8 = vmul.f32 %v1154_v1, %v1826_v6  ;;  %v1869_v28 = vld [vmem:[%s1803_s28 + $0x60] sm:$0xff]  ;;  %v294_v31 = vld [vmem:[%s2056_s2 + $0x18] sm:$0xff]  ;;  %v1883_v35 = vld [vmem:[%s1803_s28 + $0x70] sm:$0xff]  ;;  %s1053_s15 = sshll.u32 %s266_s14, 4  ;;  %s2010_s8 = scalar_lea.hbm %s2059_s5, %s1189_s12  ;;  %s2012_s15 = int_to_ptr.vmem [resolvable:$true] %s1053_s15 }
  0x3f   : > { %v312_v11 = vmul.f32 %v1154_v1, %v1831_v9  ;;  %v313_v12 = vmul.f32 %v1154_v1, %v1834_v10  ;;  %v314_v15 = vmul.f32 %v1154_v1, %v1839_v13  ;;  %v315_v16 = vmul.f32 %v1154_v1, %v1842_v14  ;;  %1438 = vmatprep.subr.bf16.mxu0 %v1437_v25  ;;  %v1886_v36 = vld [vmem:[%s1803_s28 + $0x78] sm:$0xff]  ;;  %v1896_v42 = vld [vmem:[%s2056_s2 + $0x20] sm:$0x7]  ;;  %s1590_s9 = scalar_lea.vmem %s2012_s15, 128  ;;  %s1664_s22 = smov [#allocation5]  }
  0x40   : > { %324 = vadd.xlane.f32.xlu0 %v308_v3  ;;  %328 = vadd.xlane.f32.xlu1 %v310_v4  ;;  %v316_v19 = vmul.f32 %v1154_v1, %v1847_v17  ;;  %v317_v20 = vmul.f32 %v1154_v1, %v1850_v18  ;;  %v318_v26 = vmul.f32 %v1154_v1, %v1855_v21  ;;  %p1591_p6 = scmp.ne.s32.totalorder %s2012_s15, %s1590_s9  ;;  %s1594_s10 = sshll.u32 %s1664_s22, 4  ;;  %s1595_s10 = int_to_ptr.vmem [resolvable:$false] %s1594_s10 }
  0x41   : > { %v319_v27 = vmul.f32 %v1154_v1, %v1858_v22  ;;  %1440 = vmatpush3.bf16.msra.mxu0 %v1437_v25  ;;  %v1441_v32 = vpack.c.bf16 %v294_v31, %v293_v30  ;;  %v320_v33 = vmul.f32 %v1154_v1, %v1869_v28  ;;  %v321_v34 = vmul.f32 %v1154_v1, %v1872_v29  ;;  %s1596_s11 = scalar_lea.vmem %s1595_s10, 256  ;;  %p1597_p10 = scmp.lt.s32.totalorder %s2012_s15, %s1595_s10 }
  0x42   : > { %v322_v37 = vmul.f32 %v1154_v1, %v1883_v35  ;;  %v323_v38 = vmul.f32 %v1154_v1, %v1886_v36  ;;  %v1900_v44 = vrot.slane %v1896_v42, %v358_v41  ;;  %v1903_v45 = vrot.slane %v1896_v42, %v378_v43  ;;  %p1592_p13 = pnand %p1591_p6, %p2066_p12  ;;  %p1598_p0 = scmp.lt.s32.totalorder %s1596_s11, %s1590_s9 }
  0x43   : > { %1442 = vmatprep.subr.bf16.mxu0 %v1441_v32 }
  0x44   : > { %326 = vadd.xlane.f32.xlu0 %v309_v7  ;;  %330 = vadd.xlane.f32.xlu1 %v311_v8  ;;  %p1593_p8 = pneg %p1592_p13  ;;  %p1599_p2 = por %p1598_p0, %p1597_p10 }
  0x45   : > { %1444 = vmatpush3.bf16.msra.mxu0 %v1441_v32 }
  0x46   : > { %p1600_p4 = pnand %p1599_p2, %p1593_p8 }
  0x48   : > { %332 = vadd.xlane.f32.xlu0 %v312_v11  ;;  %334 = vadd.xlane.f32.xlu1 %v313_v12 }
  0x4c   : > { %336 = vadd.xlane.f32.xlu0 %v314_v15  ;;  %338 = vadd.xlane.f32.xlu1 %v315_v16 }
  0x50   : > { %340 = vadd.xlane.f32.xlu0 %v316_v19  ;;  %342 = vadd.xlane.f32.xlu1 %v317_v20 }
  0x54   : > { %344 = vadd.xlane.f32.xlu0 %v318_v26  ;;  %346 = vadd.xlane.f32.xlu1 %v319_v27 }
  0x58   : > { %348 = vadd.xlane.f32.xlu0 %v320_v33  ;;  %350 = vadd.xlane.f32.xlu1 %v321_v34 }
  0x5c   : > { %352 = vadd.xlane.f32.xlu0 %v322_v37  ;;  %354 = vadd.xlane.f32.xlu1 %v323_v38 }
  0xcd   : > { %v325_v46 = vpop.xlane.xlu0 %324  ;;  %v329_v47 = vpop.xlane.xlu1 %328 }
  0xce   : > { %v360_v48 = vmul.f32 %v1900_v44, %v325_v46  ;;  %v362_v49 = vmul.f32 %v1900_v44, %v329_v47 }
  0xd0   : > { %v380_v50 = vadd.f32 %v1903_v45, %v360_v48  ;;  %v382_v51 = vadd.f32 %v1903_v45, %v362_v49 }
  0xd1   : > { %v327_v52 = vpop.xlane.xlu0 %326  ;;  %v331_v53 = vpop.xlane.xlu1 %330 }
  0xd2   : > { %v361_v54 = vmul.f32 %v1900_v44, %v327_v52  ;;  %v396_v55 = vmax.f32 %v380_v50, 0.0  ;;  %v363_v56 = vmul.f32 %v1900_v44, %v331_v53  ;;  %v398_v59 = vmax.f32 %v382_v51, 0.0 }
  0xd4   : > { %v381_v57 = vadd.f32 %v1903_v45, %v361_v54  ;;  %1290 = vmatprep.mubr.msk.f32.mxu0 %vm412_vm0, %v396_v55  ;;  %v383_v58 = vadd.f32 %v1903_v45, %v363_v56 }
  0xd5   : > { %v333_v60 = vpop.xlane.xlu0 %332  ;;  %v335_v61 = vpop.xlane.xlu1 %334 }
  0xd6   : > { %v397_v62 = vmax.f32 %v381_v57, 0.0  ;;  %v364_v63 = vmul.f32 %v1900_v44, %v333_v60  ;;  %v365_v0 = vmul.f32 %v1900_v44, %v335_v61  ;;  %v399_v1 = vmax.f32 %v383_v58, 0.0 }
  0xd8   : > { %1291 = vmatmul.mubr.msk.f32.vlgmr.msra.gmra.mrb[0].mxu0 %vm412_vm0, %v397_v62  ;;  %v384_v3 = vadd.f32 %v1903_v45, %v364_v63  ;;  %v385_v4 = vadd.f32 %v1903_v45, %v365_v0 }
  0xd9   : > { %1293 = vmatprep.mubr.msk.f32.mxu0 %vm412_vm0, %v398_v59  ;;  %v337_v7 = vpop.xlane.xlu0 %336  ;;  %v339_v8 = vpop.xlane.xlu1 %338 }
  0xda   : > { %v400_v11 = vmax.f32 %v384_v3, 0.0  ;;  %v366_v12 = vmul.f32 %v1900_v44, %v337_v7  ;;  %v367_v15 = vmul.f32 %v1900_v44, %v339_v8  ;;  %v401_v16 = vmax.f32 %v385_v4, 0.0  ;;  %v299_v4 = vld [vmem:[%s2057_s3 + $0x18] sm:$0xff] }
  0xdc   : > { %1294 = vmatmul.mubr.msk.f32.gmra.mrb[2].mxu0 %vm412_vm0, %v399_v1  ;;  %v386_v19 = vadd.f32 %v1903_v45, %v366_v12  ;;  %v387_v20 = vadd.f32 %v1903_v45, %v367_v15  ;;  %v297_v1 = vld [vmem:[%s2057_s3 + $0x8] sm:$0xff] }
  0xdd   : > { %1296 = vmatprep.mubr.msk.f32.mxu0 %vm412_vm0, %v400_v11  ;;  %v341_v23 = vpop.xlane.xlu0 %340  ;;  %v343_v24 = vpop.xlane.xlu1 %342 }
  0xde   : > { %v402_v25 = vmax.f32 %v386_v19, 0.0  ;;  %v368_v26 = vmul.f32 %v1900_v44, %v341_v23  ;;  %v369_v27 = vmul.f32 %v1900_v44, %v343_v24  ;;  %v403_v30 = vmax.f32 %v387_v20, 0.0 }
  0xe0   : > { %1297 = vmatmul.mubr.msk.f32.gmra.mrb[4].mxu0 %vm412_vm0, %v401_v16  ;;  %v388_v31 = vadd.f32 %v1903_v45, %v368_v26  ;;  %v389_v32 = vadd.f32 %v1903_v45, %v369_v27 }
  0xe1   : > { %1299 = vmatprep.mubr.msk.f32.mxu0 %vm412_vm0, %v402_v25  ;;  %v345_v33 = vpop.xlane.xlu0 %344  ;;  %v347_v34 = vpop.xlane.xlu1 %346 }
  0xe2   : > { %v404_v37 = vmax.f32 %v388_v31, 0.0  ;;  %v370_v38 = vmul.f32 %v1900_v44, %v345_v33  ;;  %v371_v39 = vmul.f32 %v1900_v44, %v347_v34  ;;  %v405_v41 = vmax.f32 %v389_v32, 0.0 }
  0xe4   : > { %1300 = vmatmul.mubr.msk.f32.gmra.mrb[6].mxu0 %vm412_vm0, %v403_v30  ;;  %v390_v43 = vadd.f32 %v1903_v45, %v370_v38  ;;  %v391_v46 = vadd.f32 %v1903_v45, %v371_v39 }
  0xe5   : > { %1302 = vmatprep.mubr.msk.f32.mxu0 %vm412_vm0, %v404_v37  ;;  %v349_v47 = vpop.xlane.xlu0 %348  ;;  %v351_v48 = vpop.xlane.xlu1 %350 }
  0xe6   : > { %v406_v49 = vmax.f32 %v390_v43, 0.0  ;;  %v372_v50 = vmul.f32 %v1900_v44, %v349_v47  ;;  %v373_v51 = vmul.f32 %v1900_v44, %v351_v48  ;;  %v407_v52 = vmax.f32 %v391_v46, 0.0 }
  0xe8   : > { %1303 = vmatmul.mubr.msk.f32.gmra.mrb[8].mxu0 %vm412_vm0, %v405_v41  ;;  %v392_v53 = vadd.f32 %v1903_v45, %v372_v50  ;;  %v393_v54 = vadd.f32 %v1903_v45, %v373_v51 }
  0xe9   : > { %1305 = vmatprep.mubr.msk.f32.mxu0 %vm412_vm0, %v406_v49  ;;  %v353_v55 = vpop.xlane.xlu0 %352  ;;  %v355_v56 = vpop.xlane.xlu1 %354 }
  0xea   : > { %v408_v57 = vmax.f32 %v392_v53, 0.0  ;;  %v374_v58 = vmul.f32 %v1900_v44, %v353_v55  ;;  %v375_v59 = vmul.f32 %v1900_v44, %v355_v56  ;;  %v409_v60 = vmax.f32 %v393_v54, 0.0  ;;  %v296_v44 = vld [vmem:[%s2057_s3] sm:$0xff] }
  0xeb   : > { %v1477_v3 = vpack.c.bf16 %v297_v1, %v296_v44 }
  0xec   : > { %1306 = vmatmul.mubr.msk.f32.gmra.mrb[10].mxu0 %vm412_vm0, %v407_v52  ;;  %v394_v61 = vadd.f32 %v1903_v45, %v374_v58  ;;  %v395_v62 = vadd.f32 %v1903_v45, %v375_v59  ;;  %v298_v45 = vld [vmem:[%s2057_s3 + $0x10] sm:$0xff] }
  0xed   : > { %1308 = vmatprep.mubr.msk.f32.mxu0 %vm412_vm0, %v408_v57  ;;  %v1481_v7 = vpack.c.bf16 %v299_v4, %v298_v45  ;;  %1478 = vmatprep.subr.bf16.mxu0 %v1477_v3 }
  0xee   : > { %v410_v63 = vmax.f32 %v394_v61, 0.0  ;;  %v411_v0 = vmax.f32 %v395_v62, 0.0  ;;  %1480 = vmatpush3.bf16.msra.mxu0 %v1477_v3 }
  0xef   : > { %1482 = vmatprep.subr.bf16.mxu0 %v1481_v7 }
  0xf0   : > { %1309 = vmatmul.mubr.msk.f32.gmra.mrb[12].mxu0 %vm412_vm0, %v409_v60 }
  0xf1   : > { %1311 = vmatprep.mubr.msk.f32.mxu0 %vm412_vm0, %v410_v63 }
  0xf2   : > { %1484 = vmatpush3.bf16.msra.mxu0 %v1481_v7 }
  0xf4   : > { %1312 = vmatmul.mubr.msk.f32.gmra.mrb[14].mxu0 %vm412_vm0, %v411_v0 }
 0x1ab   : > { %v1292_v8 = vpop.f32.mrb[0].mxu0 }
 0x1ac   : > { %v527_v11 = vpop.f32.mrb[1].mxu0 }
 0x1ad   : > { %v1445_v12 = vpack.c.bf16 %v1292_v8, %v527_v11 }
 0x1af   : > { %v1295_v15 = vpop.f32.mrb[2].mxu0  ;;  %1446 = vmatprep.subr.bf16.mxu1 %v1445_v12 }
 0x1b0   : > { %v537_v16 = vpop.f32.mrb[3].mxu0  ;;  %1448 = vmatpush3.bf16.msra.mxu1 %v1445_v12 }
 0x1b1   : > { %v1449_v19 = vpack.c.bf16 %v1295_v15, %v537_v16 }
 0x1b3   : > { %v1298_v20 = vpop.f32.mrb[4].mxu0  ;;  %1450 = vmatprep.subr.bf16.mxu1 %v1449_v19 }
 0x1b4   : > { %v547_v23 = vpop.f32.mrb[5].mxu0  ;;  %1452 = vmatpush3.bf16.msra.mxu1 %v1449_v19 }
 0x1b5   : > { %v1453_v24 = vpack.c.bf16 %v1298_v20, %v547_v23 }
 0x1b7   : > { %v1301_v25 = vpop.f32.mrb[6].mxu0  ;;  %1454 = vmatprep.subr.bf16.mxu1 %v1453_v24 }
 0x1b8   : > { %v557_v26 = vpop.f32.mrb[7].mxu0  ;;  %1456 = vmatpush3.bf16.msra.mxu1 %v1453_v24 }
 0x1b9   : > { %v1457_v27 = vpack.c.bf16 %v1301_v25, %v557_v26  ;;  %v1661_v26 = vmov 0.0|0.0  }
 0x1bb   : > { %v1304_v30 = vpop.f32.mrb[8].mxu0  ;;  %1458 = vmatprep.subr.bf16.mxu1 %v1457_v27 }
 0x1bc   : > { %v567_v31 = vpop.f32.mrb[9].mxu0  ;;  %1460 = vmatpush3.bf16.msra.mxu1 %v1457_v27  ;;  %v1663_v27 = vmov 0.0  }
 0x1bd   : > { %v1461_v32 = vpack.c.bf16 %v1304_v30, %v567_v31 }
 0x1bf   : > { %v1307_v33 = vpop.f32.mrb[10].mxu0  ;;  %1462 = vmatprep.subr.bf16.mxu1 %v1461_v32 }
 0x1c0   : > { %v577_v34 = vpop.f32.mrb[11].mxu0  ;;  %1464 = vmatpush3.bf16.msra.mxu1 %v1461_v32 }
 0x1c1   : > { %v1465_v37 = vpack.c.bf16 %v1307_v33, %v577_v34 }
 0x1c3   : > { %v1310_v38 = vpop.f32.mrb[12].mxu0  ;;  %1466 = vmatprep.subr.bf16.mxu1 %v1465_v37 }
 0x1c4   : > { %v587_v39 = vpop.f32.mrb[13].mxu0  ;;  %1468 = vmatpush3.bf16.msra.mxu1 %v1465_v37 }
 0x1c5   : > { %v1469_v41 = vpack.c.bf16 %v1310_v38, %v587_v39 }
 0x1c7   : > { %v1313_v43 = vpop.f32.mrb[14].mxu0  ;;  %1470 = vmatprep.subr.bf16.mxu1 %v1469_v41 }
 0x1c8   : > { %v597_v46 = vpop.f32.mrb[15].mxu0  ;;  %1472 = vmatpush3.bf16.msra.mxu1 %v1469_v41 }
 0x1c9   : > { %v1473_v47 = vpack.c.bf16 %v1313_v43, %v597_v46 }
 0x1cb   : > { %1474 = vmatprep.subr.bf16.mxu1 %v1473_v47 }
 0x1cc   : > { %1476 = vmatpush3.bf16.msra.mxu1 %v1473_v47 }
 0x1cd   : > { %1485 = vmatprep.subr.bf16.mxu1 %v1661_v26 }
 0x1cf   : > { %1347 = vmatmul.mubr.f32.vlgmr.msra.gmra.mrb[0].mxu1 %v1823_v5 }
 0x1d0   : > { %1349 = vmatprep.mubr.f32.mxu1 %v1819_v2  ;;  %v608_v2 = vsub.s32 2, %v1890_v40 }
 0x1d2   : > { %v609_v5 = vrot.slane %v1896_v42, %v608_v2 }
 0x1d3   : > { %1350 = vmatmul.mubr.f32.gmra.mrb[2].mxu1 %v1826_v6 }
 0x1d4   : > { %1352 = vmatprep.mubr.f32.mxu1 %v1831_v9 }
 0x1d7   : > { %1353 = vmatmul.mubr.f32.gmra.mrb[4].mxu1 %v1834_v10 }
 0x1d8   : > { %1355 = vmatprep.mubr.f32.mxu1 %v1839_v13 }
 0x1db   : > { %1356 = vmatmul.mubr.f32.gmra.mrb[6].mxu1 %v1842_v14 }
 0x1dc   : > { %1358 = vmatprep.mubr.f32.mxu1 %v1847_v17 }
 0x1df   : > { %1359 = vmatmul.mubr.f32.gmra.mrb[8].mxu1 %v1850_v18 }
 0x1e0   : > { %1361 = vmatprep.mubr.f32.mxu1 %v1855_v21 }
 0x1e3   : > { %1362 = vmatmul.mubr.f32.gmra.mrb[10].mxu1 %v1858_v22 }
 0x1e4   : > { %1364 = vmatprep.mubr.f32.mxu1 %v1869_v28 }
 0x1e7   : > { %1365 = vmatmul.mubr.f32.gmra.mrb[12].mxu1 %v1872_v29 }
 0x1e8   : > { %1367 = vmatprep.mubr.f32.mxu1 %v1883_v35 }
 0x1eb   : > { %1368 = vmatmul.mubr.f32.gmra.mrb[14].mxu1 %v1886_v36 }
 0x1ec   : > { %1434 = vmatprep.mubr.msk.f32.mxu1 %vm1662_vm1, %v1663_v27 }
 0x2a2   : > { %v1348_v6 = vpop.f32.mrb[0].mxu1 }
 0x2a3   : > { %v682_v9 = vadd.f32 %v1348_v6, %v609_v5  ;;  %v676_v10 = vpop.f32.mrb[1].mxu1 }
 0x2a4   : > { %v677_v13 = vadd.f32 %v676_v10, %v609_v5 }
 0x2a5   : > { %v756_v18 = vmax.f32 %v682_v9, 0.0 }
 0x2a6   : > { %v755_v14 = vmax.f32 %v677_v13, 0.0  ;;  %v1351_v17 = vpop.f32.mrb[2].mxu1 }
 0x2a7   : > { %v692_v21 = vadd.f32 %v1351_v17, %v609_v5  ;;  %v686_v22 = vpop.f32.mrb[3].mxu1 }
 0x2a8   : > { %v687_v28 = vadd.f32 %v686_v22, %v609_v5  ;;  %1378 = vmatprep.mubr.msk.f32.mxu0 %vm412_vm0, %v755_v14 }
 0x2a9   : > { %1379 = vmatmul.mubr.msk.f32.vlgmr.msra.gmra.mrb[16].mxu0 %vm412_vm0, %v756_v18  ;;  %v758_v36 = vmax.f32 %v692_v21, 0.0 }
 0x2aa   : > { %v757_v29 = vmax.f32 %v687_v28, 0.0  ;;  %v1354_v35 = vpop.f32.mrb[4].mxu1 }
 0x2ab   : > { %v702_v40 = vadd.f32 %v1354_v35, %v609_v5  ;;  %v696_v48 = vpop.f32.mrb[5].mxu1  ;;  %v1187_v35 = vld [vmem:[%s2057_s3 + $0x20] ss:$0 sm:$0xff] }
 0x2ac   : > { %v697_v42 = vadd.f32 %v696_v48, %v609_v5  ;;  %1381 = vmatprep.mubr.msk.f32.mxu0 %vm412_vm0, %v757_v29  ;;  %v301_v29 = vld [vmem:[%s273_s17] sm:$0xff] }
 0x2ad   : > { %1382 = vmatmul.mubr.msk.f32.gmra.mrb[18].mxu0 %vm412_vm0, %v758_v36  ;;  %v760_v51 = vmax.f32 %v702_v40, 0.0 }
 0x2ae   : > { %v759_v49 = vmax.f32 %v697_v42, 0.0  ;;  %v1357_v50 = vpop.f32.mrb[6].mxu1 }
 0x2af   : > { %v712_v52 = vadd.f32 %v1357_v50, %v609_v5  ;;  %v706_v53 = vpop.f32.mrb[7].mxu1 }
 0x2b0   : > { %v707_v54 = vadd.f32 %v706_v53, %v609_v5  ;;  %1384 = vmatprep.mubr.msk.f32.mxu0 %vm412_vm0, %v759_v49 }
 0x2b1   : > { %1385 = vmatmul.mubr.msk.f32.gmra.mrb[20].mxu0 %vm412_vm0, %v760_v51  ;;  %v762_v57 = vmax.f32 %v712_v52, 0.0 }
 0x2b2   : > { %v761_v55 = vmax.f32 %v707_v54, 0.0  ;;  %v1360_v56 = vpop.f32.mrb[8].mxu1 }
 0x2b3   : > { %v722_v58 = vadd.f32 %v1360_v56, %v609_v5  ;;  %v716_v59 = vpop.f32.mrb[9].mxu1 }
 0x2b4   : > { %v717_v60 = vadd.f32 %v716_v59, %v609_v5  ;;  %1387 = vmatprep.mubr.msk.f32.mxu0 %vm412_vm0, %v761_v55 }
 0x2b5   : > { %1388 = vmatmul.mubr.msk.f32.gmra.mrb[22].mxu0 %vm412_vm0, %v762_v57  ;;  %v764_v63 = vmax.f32 %v722_v58, 0.0 }
 0x2b6   : > { %v763_v61 = vmax.f32 %v717_v60, 0.0  ;;  %v1363_v62 = vpop.f32.mrb[10].mxu1 }
 0x2b7   : > { %v732_v0 = vadd.f32 %v1363_v62, %v609_v5  ;;  %v726_v44 = vpop.f32.mrb[11].mxu1 }
 0x2b8   : > { %v727_v1 = vadd.f32 %v726_v44, %v609_v5  ;;  %1390 = vmatprep.mubr.msk.f32.mxu0 %vm412_vm0, %v763_v61 }
 0x2b9   : > { %1391 = vmatmul.mubr.msk.f32.gmra.mrb[24].mxu0 %vm412_vm0, %v764_v63  ;;  %v766_v4 = vmax.f32 %v732_v0, 0.0 }
 0x2ba   : > { %v765_v45 = vmax.f32 %v727_v1, 0.0  ;;  %v1366_v3 = vpop.f32.mrb[12].mxu1 }
 0x2bb   : > { %v742_v7 = vadd.f32 %v1366_v3, %v609_v5  ;;  %v736_v8 = vpop.f32.mrb[13].mxu1 }
 0x2bc   : > { %v737_v11 = vadd.f32 %v736_v8, %v609_v5  ;;  %1393 = vmatprep.mubr.msk.f32.mxu0 %vm412_vm0, %v765_v45 }
 0x2bd   : > { %1394 = vmatmul.mubr.msk.f32.gmra.mrb[26].mxu0 %vm412_vm0, %v766_v4  ;;  %v768_v16 = vmax.f32 %v742_v7, 0.0 }
 0x2be   : > { %v767_v12 = vmax.f32 %v737_v11, 0.0  ;;  %v1369_v15 = vpop.f32.mrb[14].mxu1 }
 0x2bf   : > { %v752_v19 = vadd.f32 %v1369_v15, %v609_v5  ;;  %v746_v20 = vpop.f32.mrb[15].mxu1 }
 0x2c0   : > { %v747_v23 = vadd.f32 %v746_v20, %v609_v5  ;;  %1396 = vmatprep.mubr.msk.f32.mxu0 %vm412_vm0, %v767_v12 }
 0x2c1   : > { %1397 = vmatmul.mubr.msk.f32.gmra.mrb[28].mxu0 %vm412_vm0, %v768_v16  ;;  %v770_v25 = vmax.f32 %v752_v19, 0.0 }
 0x2c2   : > { %v769_v24 = vmax.f32 %v747_v23, 0.0 }
 0x2c4   : > { %1399 = vmatprep.mubr.msk.f32.mxu0 %vm412_vm0, %v769_v24 }
 0x2c5   : > { %1400 = vmatmul.mubr.msk.f32.gmra.mrb[30].mxu0 %vm412_vm0, %v770_v25 }
 0x37c   : > { %v1380_v30 = vpop.f32.mrb[16].mxu0 }
 0x37d   : > { %v885_v31 = vpop.f32.mrb[17].mxu0 }
 0x37e   : > { %v1486_v32 = vpack.c.bf16 %v1380_v30, %v885_v31 }
 0x380   : > { %v1383_v33 = vpop.f32.mrb[18].mxu0  ;;  %1487 = vmatpush3.bf16.msra.mxu1 %v1486_v32 }
 0x381   : > { %v895_v34 = vpop.f32.mrb[19].mxu0  ;;  %1488 = vmatprep.subr.bf16.mxu1 %v1661_v26 }
 0x382   : > { %v1489_v37 = vpack.c.bf16 %v1383_v33, %v895_v34 }
 0x384   : > { %v1386_v38 = vpop.f32.mrb[20].mxu0  ;;  %1490 = vmatpush3.bf16.msra.mxu1 %v1489_v37 }
 0x385   : > { %v905_v39 = vpop.f32.mrb[21].mxu0  ;;  %1491 = vmatprep.subr.bf16.mxu1 %v1661_v26 }
 0x386   : > { %v1492_v41 = vpack.c.bf16 %v1386_v38, %v905_v39 }
 0x388   : > { %v1389_v43 = vpop.f32.mrb[22].mxu0  ;;  %1493 = vmatpush3.bf16.msra.mxu1 %v1492_v41 }
 0x389   : > { %v915_v46 = vpop.f32.mrb[23].mxu0  ;;  %1494 = vmatprep.subr.bf16.mxu1 %v1661_v26 }
 0x38a   : > { %v1495_v47 = vpack.c.bf16 %v1389_v43, %v915_v46 }
 0x38c   : > { %v1392_v2 = vpop.f32.mrb[24].mxu0  ;;  %1496 = vmatpush3.bf16.msra.mxu1 %v1495_v47 }
 0x38d   : > { %v925_v5 = vpop.f32.mrb[25].mxu0  ;;  %1497 = vmatprep.subr.bf16.mxu1 %v1661_v26 }
 0x38e   : > { %v1498_v6 = vpack.c.bf16 %v1392_v2, %v925_v5 }
 0x390   : > { %v1395_v9 = vpop.f32.mrb[26].mxu0  ;;  %1499 = vmatpush3.bf16.msra.mxu1 %v1498_v6 }
 0x391   : > { %v935_v10 = vpop.f32.mrb[27].mxu0  ;;  %1500 = vmatprep.subr.bf16.mxu1 %v1661_v26 }
 0x392   : > { %v1501_v13 = vpack.c.bf16 %v1395_v9, %v935_v10 }
 0x394   : > { %v1398_v14 = vpop.f32.mrb[28].mxu0  ;;  %1502 = vmatpush3.bf16.msra.mxu1 %v1501_v13 }
 0x395   : > { %v945_v17 = vpop.f32.mrb[29].mxu0  ;;  %1503 = vmatprep.subr.bf16.mxu1 %v1661_v26 }
 0x396   : > { %v1504_v18 = vpack.c.bf16 %v1398_v14, %v945_v17 }
 0x398   : > { %v1401_v21 = vpop.f32.mrb[30].mxu0  ;;  %1505 = vmatpush3.bf16.msra.mxu1 %v1504_v18 }
 0x399   : > { %v955_v22 = vpop.f32.mrb[31].mxu0  ;;  %1506 = vmatprep.subr.bf16.mxu1 %v1661_v26 }
 0x39a   : > { %v1507_v28 = vpack.c.bf16 %v1401_v21, %v955_v22 }
 0x39c   : > { %1508 = vmatpush3.bf16.msra.mxu1 %v1507_v28 }
 0x39f   : > { %1435 = vmatmul.mubr.f32.vlgmr.msra.gmra.mrb[16].mxu1 %v301_v29 }
 0x472   : > { %v1034_v36 = vpop.f32.mrb[16].mxu1 }
 0x473   : > { %v1035_v40 = vadd.f32 %v1187_v35, %v1034_v36  ;;  %v1436_v48 = vpop.f32.mrb[17].mxu1 }
 0x475   : > { %1038 = vst [vmem:[%s266_s14] sm:$0xff] %v1035_v40 }
 0x476   : > { %1603 = shalt.err (!%p1600_p4)
}
 0x477   : > { %s1604_s23 = scalar_lea.hbm %s2010_s8, 128  ;;  %s1608_s25 = scalar_lea.hbm %s2059_s5, 256 }
 0x478   : > { %p1605_p5 = scmp.ne.s32.totalorder %s2010_s8, %s1604_s23  ;;  %p1609_p1 = scmp.lt.u32.totalorder %s2010_s8, %s2059_s5 }
 0x479   : > { %p1610_p3 = scmp.lt.u32.totalorder %s1608_s25, %s1604_s23  ;;  %p1612_p6 = scmp.lt.u32.totalorder %s1604_s23, %s2010_s8 }
 0x47a   : > { %p1606_p7 = pnand %p1605_p5, %p2066_p12 }
 0x47b   : > { %p1611_p11 = por %p1610_p3, %p1609_p1 }
 0x47c   : > { %p1607_p9 = pneg %p1606_p7 }
 0x47d   : > { %p1613_p13 = por %p1612_p6, %p1611_p11 }
 0x47f   : > { %p1614_p8 = pnand %p1613_p13, %p1607_p9 }
 0x481   : > { %1617 = shalt.err (!%p1614_p8)
}
 0x482   : > { %1511 = dma.vmem_to_hbm [thread:$0]  (%p2066_p12), %s2012_s15, 128, %s2010_s8, %s1040_s7  }
 0x483 PF: > { %s1065_s12 = sand.u32 1, %s1644_s18   ;;  %p2067_p10 = scmp.ne.s32.totalorder %s2064_s6, 0 }
 0x484   : > { %p2068_p0 = scmp.ge.s32.totalorder %s1656_s21, 2  ;;  %s1066_s14 = scalar_lea.sflag [#allocation4], %s1065_s12 }
 0x486   : > { %p1518_p2 = pnand %p2068_p0, %p2067_p10 }
 0x488   : > { %1639 = dma.done.wait (!%p1518_p2), %s1066_s14, 128  }
 0x489   : > { %1641 = vsyncadd (!%p1518_p2), %s1066_s14, 4294967168  ;;  %p18_p4 = scmp.ge.s32.totalorder %s1720_s24, 4   ;;  %s2069_s18 = smov %s1648_s19 }
 0x48a   : > { %s2070_s19 = smov %s1652_s20  ;;  %s2071_s20 = smov %s1732_s27 }
 0x48b   : > { %s2072_s21 = smov %s1720_s24  ;;  %20 = sbr.rel (!%p18_p4) target bundleno = 5 (0x5), region = 91 }
 0x492   :  { %1071 = vsyncpa [#allocation3], 1 }
 0x493   :  { %1073 = vsyncpa [#allocation3 + $0x1], 1 }
 0x494   :  { %1074 = vsyncpa [#allocation4], 1 }
 0x495   :  { %1076 = vsyncpa [#allocation4 + $0x1], 1 }

</bundles_post_ra>
